<compile_context>
chip_gen: v7x
topology: tpu7x:2x2x1
jax: 0.10.0
libtpu: 0.0.40
codegen_flags: <defaults>
</compile_context>

<pallas_src>
import functools

import jax
import jax.numpy as jnp
from jax.experimental import pallas as pl
from jax.experimental.pallas import tpu as pltpu

# ---------------------------------------------------------------------------
# Hyperparameters (mirror GNNLF.__init__ args)
# ---------------------------------------------------------------------------
N_NODES  = 64     # number of graph nodes
FEATURES = 16
HIDDEN   = 32
CLASSES  = 8
ALPHA    = 0.1
MU       = 0.5
DROPOUT  = 0.5    # eval mode -> identity
K_PROP   = 10     # propagation steps used by GNNLFConv's iterative solver


# ---------------------------------------------------------------------------
# Pallas kernel
#   grid = (K_PROP, N // TILE_M); k (outer) is the serial propagation step,
#   i (inner) is the row block.  Adjacency tiles (pre-scaled by c_z, bf16) are
#   streamed per (k, i); h, bias and the ping-pong z buffers live in VMEM
#   scratch for the whole grid.  All MXU operands are bf16 with f32 accumulate;
#   z itself stays f32 in VMEM (only the matmul operand is cast each step).
# ---------------------------------------------------------------------------
def gnnlf_kernel(x_ref, adj_ref, w1_ref, b1_ref, w2_ref, b2_ref, out_ref,
                 h_ref, bias_ref, z_ref,
                 *, c_h, c_ah_over_cz, tile_m, k_prop):
    f32, bf16 = jnp.float32, jnp.bfloat16
    k = pl.program_id(0)                          # propagation step (sequential)
    i = pl.program_id(1)                          # row block
    row0 = pl.multiple_of(i * tile_m, tile_m)
    rows = pl.ds(row0, tile_m)

    # ---- once: h = relu(x @ W1 + b1)   (Dropout == identity in eval mode)
    @pl.when(jnp.logical_and(k == 0, i == 0))
    def _():
        h = jnp.dot(x_ref[...].astype(bf16), w1_ref[...].astype(bf16),
                    preferred_element_type=f32)
        h_ref[...] = jnp.maximum(h + b1_ref[...], 0.0)

    adj_tile = adj_ref[...]                       # (tile_m, N) bf16 = (c_z * A_hat)[rows]

    # ---- step 0: loop-invariant bias rows + z^1 rows, sharing one MXU op
    @pl.when(k == 0)
    def _():
        t = jnp.dot(adj_tile, h_ref[...].astype(bf16),
                    preferred_element_type=f32)   # = c_z * (A_hat h)[rows]
        bias_rows = c_h * h_ref[rows, :] + c_ah_over_cz * t
        bias_ref[rows, :] = bias_rows
        z_ref[1, rows, :] = t + bias_rows         # z^1 = c_z * A_hat h + bias

    # ---- steps k >= 1: z^{k+1}[rows] = (c_z * A_hat)[rows] @ z^k + bias[rows]
    @pl.when(k > 0)
    def _():
        def prop(src, dst):                       # static buffer indices
            t = jnp.dot(adj_tile, z_ref[src].astype(bf16),
                        preferred_element_type=f32)
            z_ref[dst, rows, :] = t + bias_ref[rows, :]
        parity = k % 2                            # z^k lives in buffer k % 2
        pl.when(parity == 1)(lambda: prop(1, 0))
        pl.when(parity == 0)(lambda: prop(0, 1))

    # ---- last step: linear_2 + log_softmax on this row block
    # (output stays VMEM-resident; written back to HBM once after the grid)
    @pl.when(k == k_prop - 1)
    def _():
        z_rows = z_ref[k_prop % 2, rows, :]       # static buffer index
        logits = jnp.dot(z_rows.astype(bf16), w2_ref[...].astype(bf16),
                         preferred_element_type=f32) + b2_ref[...]
        m = jnp.max(logits, axis=1, keepdims=True)
        shifted = logits - m
        lse = jnp.log(jnp.sum(jnp.exp(shifted), axis=1, keepdims=True))
        # NOTE: CLASSES < 128 lanes -> masked stores; negligible because this
        # store happens once per row block.  Pad to a (N,128) slab if CLASSES
        # stays tiny while N scales to millions of rows.
        out_ref[rows, :] = shifted - lse


def _pick_tile_m(n):
    """Largest row-tile that divides N (bf16 sublane multiple of 16)."""
    if n <= 512:
        return n
    for t in (512, 256, 128, 64, 32, 16):
        if n % t == 0:
            return t
    return n  # fall back to whole-row residency


def _vmem_limit_bytes():
    """Per-generation scoped-VMEM limit with headroom (v7x has only 64 MiB)."""
    cap = 64 << 20  # conservative default: v7x physical VMEM per TensorCore
    try:
        cap = int(pltpu.get_tpu_info().vmem_capacity_bytes)
    except Exception:
        pass
    return int(min(48 << 20, (cap * 3) // 4))


def gnnlf_forward(x, adj, w1, b1, w2, b2, *, alpha=ALPHA, mu=MU, k_prop=K_PROP):
    n, f = x.shape
    hidden = w1.shape[1]
    classes = w2.shape[1]
    assert k_prop >= 1

    # GNN-LF closed-form coefficients (GNNLFConv)
    d    = 1.0 - alpha + alpha * mu
    c_z  = (1.0 - 2.0 * alpha + alpha * mu) / d
    c_h  = (alpha * mu) / d
    c_ah = (alpha * (1.0 - mu)) / d
    if abs(c_z) < 1e-12:
        # TODO(synk): alpha/mu combos with c_z == 0 need an unscaled-adjacency path.
        raise NotImplementedError("c_z == 0 is not supported by the fused-scale kernel")

    # Single bf16 copy of the O(N^2) operand with c_z folded in once; it is
    # streamed K times from HBM, so halving its bytes matters at scale.
    adj_c = (c_z * adj).astype(jnp.bfloat16)

    tile_m = _pick_tile_m(n)
    assert n % tile_m == 0
    grid = (k_prop, n // tile_m)

    kernel = functools.partial(gnnlf_kernel, c_h=c_h, c_ah_over_cz=c_ah / c_z,
                               tile_m=tile_m, k_prop=k_prop)
    const = lambda k, i: (0, 0)

    grid_spec = pltpu.PrefetchScalarGridSpec(
        num_scalar_prefetch=0,
        grid=grid,
        in_specs=[
            pl.BlockSpec((n, f), const),                      # x        (resident)
            pl.BlockSpec((tile_m, n), lambda k, i: (i, 0)),   # adj_c    (streamed)
            pl.BlockSpec((f, hidden), const),                 # W1       (resident)
            pl.BlockSpec((1, hidden), const),                 # b1
            pl.BlockSpec((hidden, classes), const),           # W2
            pl.BlockSpec((1, classes), const),                # b2
        ],
        out_specs=pl.BlockSpec((n, classes), const),          # log-probs (resident)
        scratch_shapes=[
            pltpu.VMEM((n, hidden), jnp.float32),             # h
            pltpu.VMEM((n, hidden), jnp.float32),             # bias (loop-invariant)
            pltpu.VMEM((2, n, hidden), jnp.float32),          # z ping-pong buffers
        ],
    )

    return pl.pallas_call(
        kernel,
        out_shape=jax.ShapeDtypeStruct((n, classes), jnp.float32),
        grid_spec=grid_spec,
        compiler_params=pltpu.CompilerParams(
            # K axis is a serial dependence; the row axis reads scratch written
            # by other row blocks (h at k=0, full z every step), so it must
            # stay sequential too (see TODO at top re: v7x dual-TC split).
            dimension_semantics=("arbitrary", "arbitrary"),
            vmem_limit_bytes=_vmem_limit_bytes(),
        ),
    )(x, adj_c, w1, b1, w2, b2)


# ---------------------------------------------------------------------------
# Glue: deterministic parameters, synthetic graph, gcn_norm (dense)
# ---------------------------------------------------------------------------
def gcn_norm_dense(edge_index, num_nodes):
    """edge_index: (2, E) int32 -> dense D^-1/2 (A + I) D^-1/2, float32."""
    src, dst = edge_index
    a = jnp.zeros((num_nodes, num_nodes), jnp.float32).at[src, dst].set(1.0)
    a = a + jnp.eye(num_nodes, dtype=jnp.float32)          # add self loops
    deg = jnp.sum(a, axis=1)
    dinv = jnp.where(deg > 0, 1.0 / jnp.sqrt(deg), 0.0)
    return dinv[:, None] * a * dinv[None, :]


def main():
    key = jax.random.PRNGKey(0)
    kx, ke, kw1, kb1, kw2, kb2 = jax.random.split(key, 6)

    # node features
    x = jax.random.normal(kx, (N_NODES, FEATURES), jnp.float32)

    # synthetic undirected graph: ring + a few random chords
    idx = jnp.arange(N_NODES, dtype=jnp.int32)
    ring_src = jnp.concatenate([idx, (idx + 1) % N_NODES])
    ring_dst = jnp.concatenate([(idx + 1) % N_NODES, idx])
    rnd = jax.random.randint(ke, (2, 32), 0, N_NODES, dtype=jnp.int32)
    src = jnp.concatenate([ring_src, rnd[0], rnd[1]])
    dst = jnp.concatenate([ring_dst, rnd[1], rnd[0]])
    edge_index = jnp.stack([src, dst])
    adj = gcn_norm_dense(edge_index, N_NODES)

    # deterministic parameters (shapes from nn.Linear(features, hidden) etc.)
    s1 = 1.0 / jnp.sqrt(FEATURES)
    s2 = 1.0 / jnp.sqrt(HIDDEN)
    w1 = jax.random.uniform(kw1, (FEATURES, HIDDEN), jnp.float32, -s1, s1)
    b1 = jax.random.uniform(kb1, (1, HIDDEN), jnp.float32, -s1, s1)
    w2 = jax.random.uniform(kw2, (HIDDEN, CLASSES), jnp.float32, -s2, s2)
    b2 = jax.random.uniform(kb2, (1, CLASSES), jnp.float32, -s2, s2)

    out = gnnlf_forward(x, adj, w1, b1, w2, b2)
    out = jax.block_until_ready(out)

    # sanity: log_softmax rows must sum to 1 in prob space
    row_sums = jnp.sum(jnp.exp(out), axis=1)
    assert out.shape == (N_NODES, CLASSES)
    assert bool(jnp.all(jnp.abs(row_sums - 1.0) < 1e-4))

    print("KERNEL_OK")


if __name__ == "__main__":
    main()
</pallas_src>

<mosaic_0001>
module attributes {stable_mosaic.version = 11 : i64} {
  func.func @gnnlf_kernel(%arg0: i32, %arg1: i32, %arg2: memref<64x16xf32, #tpu.memory_space<vmem>>, %arg3: memref<64x64xbf16, #tpu.memory_space<vmem>>, %arg4: memref<16x32xf32, #tpu.memory_space<vmem>>, %arg5: memref<1x32xf32, #tpu.memory_space<vmem>>, %arg6: memref<32x8xf32, #tpu.memory_space<vmem>>, %arg7: memref<1x8xf32, #tpu.memory_space<vmem>>, %arg8: memref<64x8xf32, #tpu.memory_space<vmem>>, %arg9: memref<64x32xf32, #tpu.memory_space<vmem>>, %arg10: memref<64x32xf32, #tpu.memory_space<vmem>>, %arg11: memref<2x64x32xf32, #tpu.memory_space<vmem>>) attributes {dimension_semantics = [#tpu.dimension_semantics<arbitrary>, #tpu.dimension_semantics<arbitrary>], iteration_bounds = array<i64: 10, 1>, scalar_prefetch = 0 : i64, scratch_operands = 3 : i64, tpu.core_type = #tpu.core_type<tc>, window_params = [{pipeline_mode = #tpu.pipeline_mode<synchronous>, transform_indices = @transform_0, window_bounds = array<i64: 64, 16>}, {transform_indices = @transform_1, window_bounds = array<i64: 64, 64>}, {pipeline_mode = #tpu.pipeline_mode<synchronous>, transform_indices = @transform_2, window_bounds = array<i64: 16, 32>}, {pipeline_mode = #tpu.pipeline_mode<synchronous>, transform_indices = @transform_3, window_bounds = array<i64: 1, 32>}, {pipeline_mode = #tpu.pipeline_mode<synchronous>, transform_indices = @transform_4, window_bounds = array<i64: 32, 8>}, {pipeline_mode = #tpu.pipeline_mode<synchronous>, transform_indices = @transform_5, window_bounds = array<i64: 1, 8>}, {pipeline_mode = #tpu.pipeline_mode<synchronous>, transform_indices = @transform_6, window_bounds = array<i64: 64, 8>}]} {
    %c64_i32 = arith.constant 64 : i32
    %0 = arith.muli %arg1, %c64_i32 : i32
    %1 = tpu.assume_multiple %0, 64 : i32
    %c0_i32 = arith.constant 0 : i32
    %2 = arith.cmpi eq, %arg0, %c0_i32 : i32
    %c0_i32_0 = arith.constant 0 : i32
    %3 = arith.cmpi eq, %arg1, %c0_i32_0 : i32
    %4 = arith.andi %2, %3 : i1
    %5 = arith.extui %4 : i1 to i32
    %c0_i32_1 = arith.constant 0 : i32
    %6 = arith.cmpi ne, %5, %c0_i32_1 : i32
    scf.if %6 {
      %c0_8 = arith.constant 0 : index
      %c0_9 = arith.constant 0 : index
      %17 = vector.load %arg2[%c0_8, %c0_9] : memref<64x16xf32, #tpu.memory_space<vmem>>, vector<64x16xf32>
      %18 = arith.truncf %17 : vector<64x16xf32> to vector<64x16xbf16>
      %c0_10 = arith.constant 0 : index
      %c0_11 = arith.constant 0 : index
      %19 = vector.load %arg4[%c0_10, %c0_11] : memref<16x32xf32, #tpu.memory_space<vmem>>, vector<16x32xf32>
      %20 = arith.truncf %19 : vector<16x32xf32> to vector<16x32xbf16>
      %cst = arith.constant dense<0.000000e+00> : vector<64x32xf32>
      %21 = tpu.matmul %18, %20, %cst {dimension_numbers = #tpu.dot_dimension_numbers<[1], [0], [0], [1], [0, 0, 1, 1], [], []>} : vector<64x16xbf16>, vector<16x32xbf16>, vector<64x32xf32> -> vector<64x32xf32>
      %c0_12 = arith.constant 0 : index
      %c0_13 = arith.constant 0 : index
      %22 = vector.load %arg5[%c0_12, %c0_13] : memref<1x32xf32, #tpu.memory_space<vmem>>, vector<1x32xf32>
      %23 = vector.broadcast %22 : vector<1x32xf32> to vector<64x32xf32>
      %24 = arith.addf %21, %23 : vector<64x32xf32>
      %cst_14 = arith.constant 0.000000e+00 : f32
      %25 = vector.broadcast %cst_14 : f32 to vector<64x32xf32>
      %26 = arith.maximumf %24, %25 : vector<64x32xf32>
      %c0_15 = arith.constant 0 : index
      %c0_16 = arith.constant 0 : index
      %27 = vector.load %arg9[%c0_15, %c0_16] : memref<64x32xf32, #tpu.memory_space<vmem>>, vector<64x32xf32>
      tpu.vector_store %arg9[%c0_15, %c0_16], %26 {strides = array<i32>} : memref<64x32xf32, #tpu.memory_space<vmem>>, vector<64x32xf32>,
    } else {
    }
    %c0 = arith.constant 0 : index
    %c0_2 = arith.constant 0 : index
    %7 = vector.load %arg3[%c0, %c0_2] : memref<64x64xbf16, #tpu.memory_space<vmem>>, vector<64x64xbf16>
    %c0_i32_3 = arith.constant 0 : i32
    %8 = arith.cmpi eq, %arg0, %c0_i32_3 : i32
    %9 = arith.extui %8 : i1 to i32
    %c0_i32_4 = arith.constant 0 : i32
    %10 = arith.cmpi ne, %9, %c0_i32_4 : i32
    scf.if %10 {
      %c0_8 = arith.constant 0 : index
      %c0_9 = arith.constant 0 : index
      %17 = vector.load %arg9[%c0_8, %c0_9] : memref<64x32xf32, #tpu.memory_space<vmem>>, vector<64x32xf32>
      %18 = arith.truncf %17 : vector<64x32xf32> to vector<64x32xbf16>
      %cst = arith.constant dense<0.000000e+00> : vector<64x32xf32>
      %19 = tpu.matmul %7, %18, %cst {dimension_numbers = #tpu.dot_dimension_numbers<[1], [0], [0], [1], [0, 0, 1, 1], [], []>} : vector<64x64xbf16>, vector<64x32xbf16>, vector<64x32xf32> -> vector<64x32xf32>
      %20 = arith.index_cast %1 : i32 to index
      %c0_10 = arith.constant 0 : index
      %21 = vector.load %arg9[%20, %c0_10] : memref<64x32xf32, #tpu.memory_space<vmem>>, vector<64x32xf32>
      %cst_11 = arith.constant 0.0526315793 : f32
      %22 = vector.broadcast %cst_11 : f32 to vector<64x32xf32>
      %23 = arith.mulf %22, %21 : vector<64x32xf32>
      %cst_12 = arith.constant 0.0588235296 : f32
      %24 = vector.broadcast %cst_12 : f32 to vector<64x32xf32>
      %25 = arith.mulf %24, %19 : vector<64x32xf32>
      %26 = arith.addf %23, %25 : vector<64x32xf32>
      %27 = arith.index_cast %1 : i32 to index
      %c0_13 = arith.constant 0 : index
      %28 = vector.load %arg10[%27, %c0_13] : memref<64x32xf32, #tpu.memory_space<vmem>>, vector<64x32xf32>
      tpu.vector_store %arg10[%27, %c0_13], %26 {strides = array<i32>} : memref<64x32xf32, #tpu.memory_space<vmem>>, vector<64x32xf32>,
      %29 = arith.addf %19, %26 : vector<64x32xf32>
      %c1 = arith.constant 1 : index
      %30 = arith.index_cast %1 : i32 to index
      %c0_14 = arith.constant 0 : index
      %31 = vector.load %arg11[%c1, %30, %c0_14] : memref<2x64x32xf32, #tpu.memory_space<vmem>>, vector<1x64x32xf32>
      %32 = vector.shape_cast %31 : vector<1x64x32xf32> to vector<64x32xf32>
      %33 = vector.shape_cast %29 : vector<64x32xf32> to vector<1x64x32xf32>
      tpu.vector_store %arg11[%c1, %30, %c0_14], %33 {strides = array<i32>} : memref<2x64x32xf32, #tpu.memory_space<vmem>>, vector<1x64x32xf32>,
    } else {
    }
    %c0_i32_5 = arith.constant 0 : i32
    %11 = arith.cmpi sgt, %arg0, %c0_i32_5 : i32
    %12 = arith.extui %11 : i1 to i32
    %c0_i32_6 = arith.constant 0 : i32
    %13 = arith.cmpi ne, %12, %c0_i32_6 : i32
    scf.if %13 {
      %c2_i32 = arith.constant 2 : i32
      %c0_i32_8 = arith.constant 0 : i32
      %17 = arith.cmpi eq, %c2_i32, %c0_i32_8 : i32
      %c1_i32 = arith.constant 1 : i32
      %18 = arith.select %17, %c1_i32, %c2_i32 : i32
      %19 = arith.remsi %arg0, %18 : i32
      %c0_i32_9 = arith.constant 0 : i32
      %20 = arith.cmpi ne, %19, %c0_i32_9 : i32
      %c0_i32_10 = arith.constant 0 : i32
      %21 = arith.cmpi slt, %19, %c0_i32_10 : i32
      %c0_i32_11 = arith.constant 0 : i32
      %22 = arith.cmpi slt, %18, %c0_i32_11 : i32
      %23 = arith.xori %21, %22 : i1
      %24 = arith.andi %23, %20 : i1
      %25 = arith.addi %19, %18 : i32
      %26 = arith.select %24, %25, %19 : i32
      %c1_i32_12 = arith.constant 1 : i32
      %27 = arith.cmpi eq, %26, %c1_i32_12 : i32
      %28 = arith.extui %27 : i1 to i32
      %c0_i32_13 = arith.constant 0 : i32
      %29 = arith.cmpi ne, %28, %c0_i32_13 : i32
      scf.if %29 {
        %c1 = arith.constant 1 : index
        %c0_16 = arith.constant 0 : index
        %c0_17 = arith.constant 0 : index
        %33 = vector.load %arg11[%c1, %c0_16, %c0_17] : memref<2x64x32xf32, #tpu.memory_space<vmem>>, vector<1x64x32xf32>
        %34 = vector.shape_cast %33 : vector<1x64x32xf32> to vector<64x32xf32>
        %35 = arith.truncf %34 : vector<64x32xf32> to vector<64x32xbf16>
        %cst = arith.constant dense<0.000000e+00> : vector<64x32xf32>
        %36 = tpu.matmul %7, %35, %cst {dimension_numbers = #tpu.dot_dimension_numbers<[1], [0], [0], [1], [0, 0, 1, 1], [], []>} : vector<64x64xbf16>, vector<64x32xbf16>, vector<64x32xf32> -> vector<64x32xf32>
        %37 = arith.index_cast %1 : i32 to index
        %c0_18 = arith.constant 0 : index
        %38 = vector.load %arg10[%37, %c0_18] : memref<64x32xf32, #tpu.memory_space<vmem>>, vector<64x32xf32>
        %39 = arith.addf %36, %38 : vector<64x32xf32>
        %c0_19 = arith.constant 0 : index
        %40 = arith.index_cast %1 : i32 to index
        %c0_20 = arith.constant 0 : index
        %41 = vector.load %arg11[%c0_19, %40, %c0_20] : memref<2x64x32xf32, #tpu.memory_space<vmem>>, vector<1x64x32xf32>
        %42 = vector.shape_cast %41 : vector<1x64x32xf32> to vector<64x32xf32>
        %43 = vector.shape_cast %39 : vector<64x32xf32> to vector<1x64x32xf32>
        tpu.vector_store %arg11[%c0_19, %40, %c0_20], %43 {strides = array<i32>} : memref<2x64x32xf32, #tpu.memory_space<vmem>>, vector<1x64x32xf32>,
      } else {
      }
      %c0_i32_14 = arith.constant 0 : i32
      %30 = arith.cmpi eq, %26, %c0_i32_14 : i32
      %31 = arith.extui %30 : i1 to i32
      %c0_i32_15 = arith.constant 0 : i32
      %32 = arith.cmpi ne, %31, %c0_i32_15 : i32
      scf.if %32 {
        %c0_16 = arith.constant 0 : index
        %c0_17 = arith.constant 0 : index
        %c0_18 = arith.constant 0 : index
        %33 = vector.load %arg11[%c0_16, %c0_17, %c0_18] : memref<2x64x32xf32, #tpu.memory_space<vmem>>, vector<1x64x32xf32>
        %34 = vector.shape_cast %33 : vector<1x64x32xf32> to vector<64x32xf32>
        %35 = arith.truncf %34 : vector<64x32xf32> to vector<64x32xbf16>
        %cst = arith.constant dense<0.000000e+00> : vector<64x32xf32>
        %36 = tpu.matmul %7, %35, %cst {dimension_numbers = #tpu.dot_dimension_numbers<[1], [0], [0], [1], [0, 0, 1, 1], [], []>} : vector<64x64xbf16>, vector<64x32xbf16>, vector<64x32xf32> -> vector<64x32xf32>
        %37 = arith.index_cast %1 : i32 to index
        %c0_19 = arith.constant 0 : index
        %38 = vector.load %arg10[%37, %c0_19] : memref<64x32xf32, #tpu.memory_space<vmem>>, vector<64x32xf32>
        %39 = arith.addf %36, %38 : vector<64x32xf32>
        %c1 = arith.constant 1 : index
        %40 = arith.index_cast %1 : i32 to index
        %c0_20 = arith.constant 0 : index
        %41 = vector.load %arg11[%c1, %40, %c0_20] : memref<2x64x32xf32, #tpu.memory_space<vmem>>, vector<1x64x32xf32>
        %42 = vector.shape_cast %41 : vector<1x64x32xf32> to vector<64x32xf32>
        %43 = vector.shape_cast %39 : vector<64x32xf32> to vector<1x64x32xf32>
        tpu.vector_store %arg11[%c1, %40, %c0_20], %43 {strides = array<i32>} : memref<2x64x32xf32, #tpu.memory_space<vmem>>, vector<1x64x32xf32>,
      } else {
      }
    } else {
    }
    %c9_i32 = arith.constant 9 : i32
    %14 = arith.cmpi eq, %arg0, %c9_i32 : i32
    %15 = arith.extui %14 : i1 to i32
    %c0_i32_7 = arith.constant 0 : i32
    %16 = arith.cmpi ne, %15, %c0_i32_7 : i32
    scf.if %16 {
      %c0_8 = arith.constant 0 : index
      %17 = arith.index_cast %1 : i32 to index
      %c0_9 = arith.constant 0 : index
      %18 = vector.load %arg11[%c0_8, %17, %c0_9] : memref<2x64x32xf32, #tpu.memory_space<vmem>>, vector<1x64x32xf32>
      %19 = vector.shape_cast %18 : vector<1x64x32xf32> to vector<64x32xf32>
      %20 = arith.truncf %19 : vector<64x32xf32> to vector<64x32xbf16>
      %c0_10 = arith.constant 0 : index
      %c0_11 = arith.constant 0 : index
      %21 = vector.load %arg6[%c0_10, %c0_11] : memref<32x8xf32, #tpu.memory_space<vmem>>, vector<32x8xf32>
      %22 = arith.truncf %21 : vector<32x8xf32> to vector<32x8xbf16>
      %cst = arith.constant dense<0.000000e+00> : vector<64x8xf32>
      %23 = tpu.matmul %20, %22, %cst {dimension_numbers = #tpu.dot_dimension_numbers<[1], [0], [0], [1], [0, 0, 1, 1], [], []>} : vector<64x32xbf16>, vector<32x8xbf16>, vector<64x8xf32> -> vector<64x8xf32>
      %c0_12 = arith.constant 0 : index
      %c0_13 = arith.constant 0 : index
      %24 = vector.load %arg7[%c0_12, %c0_13] : memref<1x8xf32, #tpu.memory_space<vmem>>, vector<1x8xf32>
      %25 = vector.broadcast %24 : vector<1x8xf32> to vector<64x8xf32>
      %26 = arith.addf %23, %25 : vector<64x8xf32>
      %cst_14 = arith.constant dense<0xFF800000> : vector<64xf32>
      %27 = vector.multi_reduction <maximumf>, %26, %cst_14 [1] : vector<64x8xf32> to vector<64xf32>
      %28 = vector.shape_cast %27 : vector<64xf32> to vector<64x1xf32>
      %29 = vector.broadcast %28 : vector<64x1xf32> to vector<64x8xf32>
      %30 = arith.subf %26, %29 : vector<64x8xf32>
      %31 = math.exp %30 : vector<64x8xf32>
      %cst_15 = arith.constant dense<0.000000e+00> : vector<64xf32>
      %32 = vector.multi_reduction <add>, %31, %cst_15 [1] : vector<64x8xf32> to vector<64xf32>
      %33 = vector.shape_cast %32 : vector<64xf32> to vector<64x1xf32>
      %34 = math.log %33 : vector<64x1xf32>
      %35 = vector.broadcast %34 : vector<64x1xf32> to vector<64x8xf32>
      %36 = arith.subf %30, %35 : vector<64x8xf32>
      %37 = arith.index_cast %1 : i32 to index
      %c0_16 = arith.constant 0 : index
      %38 = vector.load %arg8[%37, %c0_16] : memref<64x8xf32, #tpu.memory_space<vmem>>, vector<64x8xf32>
      tpu.vector_store %arg8[%37, %c0_16], %36 {strides = array<i32>} : memref<64x8xf32, #tpu.memory_space<vmem>>, vector<64x8xf32>,
    } else {
    }
    return
  }
  func.func @transform_0(%arg0: i32, %arg1: i32) -> (i32, i32) {
    %c0_i32 = arith.constant 0 : i32
    %c0_i32_0 = arith.constant 0 : i32
    %c0_i32_1 = arith.constant 0 : i32
    return %c0_i32, %c0_i32_0 : i32, i32
  }
  func.func @transform_1(%arg0: i32, %arg1: i32) -> (i32, i32) {
    %c0_i32 = arith.constant 0 : i32
    %c0_i32_0 = arith.constant 0 : i32
    return %arg1, %c0_i32 : i32, i32
  }
  func.func @transform_2(%arg0: i32, %arg1: i32) -> (i32, i32) {
    %c0_i32 = arith.constant 0 : i32
    %c0_i32_0 = arith.constant 0 : i32
    %c0_i32_1 = arith.constant 0 : i32
    return %c0_i32, %c0_i32_0 : i32, i32
  }
  func.func @transform_3(%arg0: i32, %arg1: i32) -> (i32, i32) {
    %c0_i32 = arith.constant 0 : i32
    %c0_i32_0 = arith.constant 0 : i32
    %c0_i32_1 = arith.constant 0 : i32
    return %c0_i32, %c0_i32_0 : i32, i32
  }
  func.func @transform_4(%arg0: i32, %arg1: i32) -> (i32, i32) {
    %c0_i32 = arith.constant 0 : i32
    %c0_i32_0 = arith.constant 0 : i32
    %c0_i32_1 = arith.constant 0 : i32
    return %c0_i32, %c0_i32_0 : i32, i32
  }
  func.func @transform_5(%arg0: i32, %arg1: i32) -> (i32, i32) {
    %c0_i32 = arith.constant 0 : i32
    %c0_i32_0 = arith.constant 0 : i32
    %c0_i32_1 = arith.constant 0 : i32
    return %c0_i32, %c0_i32_0 : i32, i32
  }
  func.func @transform_6(%arg0: i32, %arg1: i32) -> (i32, i32) {
    %c0_i32 = arith.constant 0 : i32
    %c0_i32_0 = arith.constant 0 : i32
    %c0_i32_1 = arith.constant 0 : i32
    return %c0_i32, %c0_i32_0 : i32, i32
  }
}

</mosaic_0001>

<bundles_post_ra>
// kernel: tpu_custom_call.1
= control target key start
LH: loop header
LB: loop body
LE: loop exit
PB: predicated region body
PF: predicated region fallthrough
CT: control target
= control target key end

     0   :  { %s1432_s21 = smov 0   ;;  %s1434_s22 = smov 0   ;;  %s1720_s0 = inlined_call_operand.vmem [shape: f32[64,16], index: 0, kind: input, shape index: {}]   ;;  %s1721_s1 = inlined_call_operand.vmem [shape: bf16[64,64], index: 1, kind: input, shape index: {}]   ;;  %s1722_s2 = inlined_call_operand.vmem [shape: f32[16,32], index: 2, kind: input, shape index: {}]   ;;  %s1723_s3 = inlined_call_operand.vmem [shape: f32[1,32], index: 3, kind: input, shape index: {}]   ;;  %s1724_s4 = inlined_call_operand.vmem [shape: f32[32,8], index: 4, kind: input, shape index: {}]   ;;  %s1725_s5 = inlined_call_operand.vmem [shape: f32[1,8], index: 5, kind: input, shape index: {}]   ;;  %s1726_s6 = inlined_call_operand.vmem [shape: f32[64,8], index: 6, kind: output, shape index: {}]  }
   0x1   :  { %s1436_s23 = smov 0  }
   0x2 LB: > { %s28_s24 = sadd.s32 1, %s1391_s22  ;;  %p1119_p0 = scmp.ge.s32.totalorder %s1395_s23, 1  ;;  %s1395_s23 = sphi %s1436_s23, %s16_s23   ;;  %s1391_s22 = sphi %s1434_s22, %s1728_s22   ;;  %s1387_s21 = sphi %s1432_s21, %s1727_s21  }
   0x3   : > { %p30_p1 = scmp.ge.s32.totalorder %s28_s24, 10  ;;  %p220_p2 = scmp.lt.s32.totalorder %s1395_s23, 11 }
   0x5   : > { %s1730_s24 = smov (%p30_p1, %s28_s24), 0  ;;  %p221_p3 = pnand %p1119_p0, %p220_p2 }
   0x6   : > { %p253_p4 = scmp.eq.s32.totalorder (!%p221_p3), %s1387_s21, 0 }
   0x7   : > { %224 = sbr.rel (%p221_p3) target bundleno = 1544 (0x608), region = 44 }
   0xe   : > { %258 = sbr.rel (!%p253_p4) target bundleno = 241 (0xf1), region = 48  ;;  %v271_v0 = vld [vmem:[%s1722_s2] sm:$0xff] (%p253_p4)  ;;  %v272_v1 = vld [vmem:[%s1722_s2 + $0x8] sm:$0xff] (%p253_p4)  ;;  %vm281_vm0 = vcmask (%p253_p4), 130048   ;;  %v261_v9 = vld [vmem:[%s1720_s0 + $0x10] sm:$0xff] (%p253_p4)  ;;  %vm367_vm1 = vcmask (%p253_p4), 261120  }
   0xf   : > { %v259_v2 = vld [vmem:[%s1720_s0] sm:$0xff] (%p253_p4)  ;;  %v273_v3 = vpack.c.bf16 (%p253_p4), %v272_v1, %v271_v0  ;;  %v260_v4 = vld [vmem:[%s1720_s0 + $0x8] sm:$0xff] (%p253_p4)  ;;  %v262_v10 = vld [vmem:[%s1720_s0 + $0x18] sm:$0xff] (%p253_p4) }
  0x10   : > { %v263_v5 = vld [vmem:[%s1720_s0 + $0x20] sm:$0xff] (%p253_p4)  ;;  %v264_v6 = vld [vmem:[%s1720_s0 + $0x28] sm:$0xff] (%p253_p4)  ;;  %v267_v7 = vpack.c.bf16 (%p253_p4), %v260_v4, %v259_v2  ;;  %v265_v11 = vld [vmem:[%s1720_s0 + $0x30] sm:$0xff] (%p253_p4)  ;;  %v268_v12 = vpack.c.bf16 (%p253_p4), %v262_v10, %v261_v9 }
  0x11   : > { %v269_v8 = vpack.c.bf16 (%p253_p4), %v264_v6, %v263_v5  ;;  %1217 = vmatprep.subr.bf16.mxu0 (%p253_p4), %v273_v3  ;;  %1287 = vmatprep.subr.bf16.mxu1 (%p253_p4), %v273_v3  ;;  %v266_v13 = vld [vmem:[%s1720_s0 + $0x38] sm:$0xff] (%p253_p4)  ;;  %v1121_v15 = vld [vmem:[%s1723_s3] ss:$0 sm:$0xff] (%p253_p4) }
  0x12   : > { %1218 = vmatpush3.bf16.msra.mxu0 (%p253_p4), %v273_v3  ;;  %1288 = vmatpush3.bf16.msra.mxu1 (%p253_p4), %v273_v3  ;;  %v270_v14 = vpack.c.bf16 (%p253_p4), %v266_v13, %v265_v11 }
  0x13   : > { %1219 = vmatprep.mubr.msk.bf16.mxu0 (%p253_p4), %vm281_vm0, %v267_v7  ;;  %1223 = vmatprep.mubr.msk.bf16.mxu1 (%p253_p4), %vm281_vm0, %v269_v8 }
  0x15   : > { %1220 = vmatmul.mubr.msk.bf16.vlgmr.msra.gmra.mrb[0].mxu0 %vm281_vm0, %v268_v12  ;;  %1224 = vmatmul.mubr.msk.bf16.vlgmr.msra.gmra.mrb[0].mxu1 %vm281_vm0, %v270_v14 }
  0xe8   : > { %v1221_v16 = vpop.f32.mrb[0].mxu0  ;;  %v1225_v17 = vpop.f32.mrb[0].mxu1 }
  0xe9   : > { %v337_v18 = vadd.f32 %v1221_v16, %v1121_v15  ;;  %v353_v19 = vadd.f32 %v1225_v17, %v1121_v15  ;;  %v328_v20 = vpop.f32.mrb[1].mxu0  ;;  %v344_v21 = vpop.f32.mrb[1].mxu1 }
  0xea   : > { %v329_v22 = vadd.f32 %v1121_v15, %v328_v20  ;;  %v345_v23 = vadd.f32 %v1121_v15, %v344_v21  ;;  %v1222_v24 = vpop.f32.mrb[2].mxu0  ;;  %v1226_v25 = vpop.f32.mrb[2].mxu1 }
  0xeb   : > { %v361_v26 = vmax.f32 %v337_v18, 0.0  ;;  %v365_v27 = vmax.f32 %v353_v19, 0.0  ;;  %v340_v28 = vadd.f32 %v1222_v24, %v1121_v15  ;;  %v356_v29 = vadd.f32 %v1226_v25, %v1121_v15  ;;  %v331_v30 = vpop.f32.mrb[3].mxu0  ;;  %v347_v31 = vpop.f32.mrb[3].mxu1 }
  0xec   : > { %v359_v32 = vmax.f32 %v329_v22, 0.0  ;;  %v363_v33 = vmax.f32 %v345_v23, 0.0  ;;  %v332_v34 = vadd.f32 %v1121_v15, %v331_v30  ;;  %v348_v35 = vadd.f32 %v1121_v15, %v347_v31 }
  0xed   : > { %370 = vst.msk [vmem:[#allocation2 + $0x10] sm:$0xff] %vm367_vm1, %v361_v26  ;;  %374 = vst.msk [vmem:[#allocation2 + $0x30] sm:$0xff] %vm367_vm1, %v365_v27  ;;  %v362_v36 = vmax.f32 %v340_v28, 0.0  ;;  %v366_v37 = vmax.f32 %v356_v29, 0.0 }
  0xee   : > { %368 = vst.msk [vmem:[#allocation2] sm:$0xff] %vm367_vm1, %v359_v32  ;;  %372 = vst.msk [vmem:[#allocation2 + $0x20] sm:$0xff] %vm367_vm1, %v363_v33  ;;  %v360_v38 = vmax.f32 %v332_v34, 0.0  ;;  %v364_v39 = vmax.f32 %v348_v35, 0.0 }
  0xef   : > { %371 = vst.msk [vmem:[#allocation2 + $0x18] sm:$0xff] %vm367_vm1, %v362_v36  ;;  %375 = vst.msk [vmem:[#allocation2 + $0x38] sm:$0xff] %vm367_vm1, %v366_v37 }
  0xf0   : > { %369 = vst.msk [vmem:[#allocation2 + $0x8] sm:$0xff] %vm367_vm1, %v360_v38  ;;  %373 = vst.msk [vmem:[#allocation2 + $0x28] sm:$0xff] %vm367_vm1, %v364_v39 }
  0xf1 PF: > { %v1497_v40 = vld [vmem:[%s1721_s1] sm:$0xf]  ;;  %v1502_v41 = vld [vmem:[%s1721_s1 + $0x4] sm:$0xf]  ;;  %v1507_v42 = vld [vmem:[%s1721_s1 + $0x8] sm:$0xf] }
  0xf2   : > { %v1512_v43 = vld [vmem:[%s1721_s1 + $0xc] sm:$0xf]  ;;  %v1517_v44 = vld [vmem:[%s1721_s1 + $0x10] sm:$0xf]  ;;  %v1522_v45 = vld [vmem:[%s1721_s1 + $0x14] sm:$0xf] }
  0xf3   : > { %v1527_v46 = vld [vmem:[%s1721_s1 + $0x18] sm:$0xf]  ;;  %v1532_v47 = vld [vmem:[%s1721_s1 + $0x1c] sm:$0xf]  ;;  %p1126_p5 = scmp.ne.s32.totalorder %s1387_s21, 0 }
  0xf4   : > { %v389_v50 = vld [vmem:[#allocation2 + $0x10] sm:$0xff] (!%p1126_p5)  ;;  %v1127_v51 = vcombine.low (!%p1126_p5), %v1497_v40, %v1502_v41  ;;  %vm419_vm2 = vcmask (!%p1126_p5), 523264   ;;  %v1129_v52 = vcombine.low (!%p1126_p5), %v1517_v44, %v1522_v45  ;;  %v1128_v62 = vcombine.low (!%p1126_p5), %v1507_v42, %v1512_v43 }
  0xf5   : > { %386 = sbr.rel (%p1126_p5) target bundleno = 490 (0x1ea), region = 52  ;;  %v387_v48 = vld [vmem:[#allocation2] sm:$0xff] (!%p1126_p5)  ;;  %v393_v59 = vld [vmem:[#allocation2 + $0x30] sm:$0xff] (!%p1126_p5)  ;;  %v1130_v63 = vcombine.low (!%p1126_p5), %v1527_v46, %v1532_v47  ;;  %v508_v0 = vmul.f32 (!%p1126_p5), 0.05263158, %v389_v50  ;;  %vm531_vm3 = vcmask (!%p1126_p5), 261120  }
  0xf6   : > { %v390_v54 = vld [vmem:[#allocation2 + $0x18] sm:$0xff] (!%p1126_p5)  ;;  %v391_v56 = vld [vmem:[#allocation2 + $0x20] sm:$0xff] (!%p1126_p5)  ;;  %1235 = vmatprep.mubr.msk.bf16.mxu0 (!%p1126_p5), %vm419_vm2, %v1127_v51  ;;  %1239 = vmatprep.mubr.msk.bf16.mxu1 (!%p1126_p5), %vm419_vm2, %v1129_v52  ;;  %v512_v1 = vmul.f32 (!%p1126_p5), 0.05263158, %v393_v59  ;;  %v506_v2 = vmul.f32 (!%p1126_p5), 0.05263158, %v387_v48 }
  0xf7   : > { %v388_v49 = vld [vmem:[#allocation2 + $0x8] sm:$0xff] (!%p1126_p5)  ;;  %v396_v55 = vpack.c.bf16 (!%p1126_p5), %v390_v54, %v389_v50  ;;  %v394_v60 = vld [vmem:[#allocation2 + $0x38] sm:$0xff] (!%p1126_p5)  ;;  %v510_v3 = vmul.f32 (!%p1126_p5), 0.05263158, %v391_v56  ;;  %v509_v4 = vmul.f32 (!%p1126_p5), 0.05263158, %v390_v54 }
  0xf8   : > { %v395_v53 = vpack.c.bf16 (!%p1126_p5), %v388_v49, %v387_v48  ;;  %v392_v57 = vld [vmem:[#allocation2 + $0x28] sm:$0xff] (!%p1126_p5)  ;;  %v398_v61 = vpack.c.bf16 (!%p1126_p5), %v394_v60, %v393_v59  ;;  %v513_v5 = vmul.f32 (!%p1126_p5), 0.05263158, %v394_v60  ;;  %v507_v8 = vmul.f32 (!%p1126_p5), 0.05263158, %v388_v49 }
  0xf9   : > { %v397_v58 = vpack.c.bf16 (!%p1126_p5), %v392_v57, %v391_v56  ;;  %v511_v9 = vmul.f32 (!%p1126_p5), 0.05263158, %v392_v57 }
  0xfa   : > { %1227 = vmatprep.subr.bf16.mxu0 (!%p1126_p5), %v395_v53  ;;  %1289 = vmatprep.subr.bf16.mxu1 (!%p1126_p5), %v395_v53 }
  0xfb   : > { %1228 = vmatpush3.bf16.msra.mxu0 (!%p1126_p5), %v395_v53  ;;  %1293 = vmatpush3.bf16.msra.mxu1 (!%p1126_p5), %v395_v53 }
  0xfc   : > { %1229 = vmatprep.subr.bf16.mxu0 %v396_v55  ;;  %1290 = vmatprep.subr.bf16.mxu1 %v396_v55 }
  0xff   : > { %1230 = vmatpush3.bf16.msra.mxu0 %v396_v55  ;;  %1294 = vmatpush3.bf16.msra.mxu1 %v396_v55 }
 0x100   : > { %1231 = vmatprep.subr.bf16.mxu0 %v397_v58  ;;  %1291 = vmatprep.subr.bf16.mxu1 %v397_v58 }
 0x103   : > { %1232 = vmatpush3.bf16.msra.mxu0 %v397_v58  ;;  %1295 = vmatpush3.bf16.msra.mxu1 %v397_v58 }
 0x104   : > { %1233 = vmatprep.subr.bf16.mxu0 %v398_v61  ;;  %1292 = vmatprep.subr.bf16.mxu1 %v398_v61 }
 0x107   : > { %1234 = vmatpush3.bf16.msra.mxu0 %v398_v61  ;;  %1296 = vmatpush3.bf16.msra.mxu1 %v398_v61 }
 0x10a   : > { %1236 = vmatmul.mubr.msk.bf16.vlgmr.msra.gmra.mrb[0].mxu0 %vm419_vm2, %v1128_v62  ;;  %1240 = vmatmul.mubr.msk.bf16.vlgmr.msra.gmra.mrb[0].mxu1 %vm419_vm2, %v1130_v63 }
 0x1dd   : > { %v1237_v6 = vpop.f32.mrb[0].mxu0  ;;  %v1241_v7 = vpop.f32.mrb[0].mxu1 }
 0x1de   : > { %v516_v10 = vmul.f32 0.05882353, %v1237_v6  ;;  %v520_v11 = vmul.f32 0.05882353, %v1241_v7  ;;  %v466_v12 = vpop.f32.mrb[1].mxu0  ;;  %v482_v13 = vpop.f32.mrb[1].mxu1 }
 0x1df   : > { %v514_v14 = vmul.f32 0.05882353, %v466_v12  ;;  %v518_v15 = vmul.f32 0.05882353, %v482_v13  ;;  %v1238_v16 = vpop.f32.mrb[2].mxu0  ;;  %v1242_v17 = vpop.f32.mrb[2].mxu1 }
 0x1e0   : > { %v524_v18 = vadd.f32 %v516_v10, %v508_v0  ;;  %v528_v19 = vadd.f32 %v520_v11, %v512_v1  ;;  %v517_v20 = vmul.f32 0.05882353, %v1238_v16  ;;  %v521_v21 = vmul.f32 0.05882353, %v1242_v17  ;;  %v469_v22 = vpop.f32.mrb[3].mxu0  ;;  %v485_v23 = vpop.f32.mrb[3].mxu1 }
 0x1e1   : > { %v522_v24 = vadd.f32 %v514_v14, %v506_v2  ;;  %v526_v25 = vadd.f32 %v518_v15, %v510_v3  ;;  %v515_v26 = vmul.f32 0.05882353, %v469_v22  ;;  %v519_v27 = vmul.f32 0.05882353, %v485_v23 }
 0x1e2   : > { %534 = vst.msk [vmem:[#allocation3 + $0x10] sm:$0xff] %vm531_vm3, %v524_v18  ;;  %v542_v28 = vadd.f32 %v1237_v6, %v524_v18  ;;  %538 = vst.msk [vmem:[#allocation3 + $0x30] sm:$0xff] %vm531_vm3, %v528_v19  ;;  %v546_v29 = vadd.f32 %v1241_v7, %v528_v19  ;;  %v525_v30 = vadd.f32 %v517_v20, %v509_v4 }
 0x1e3   : > { %v529_v31 = vadd.f32 %v521_v21, %v513_v5  ;;  %532 = vst.msk [vmem:[#allocation3] sm:$0xff] %vm531_vm3, %v522_v24  ;;  %v540_v32 = vadd.f32 %v522_v24, %v466_v12  ;;  %536 = vst.msk [vmem:[#allocation3 + $0x20] sm:$0xff] %vm531_vm3, %v526_v25  ;;  %v544_v33 = vadd.f32 %v526_v25, %v482_v13 }
 0x1e4   : > { %v523_v34 = vadd.f32 %v515_v26, %v507_v8  ;;  %v527_v35 = vadd.f32 %v519_v27, %v511_v9  ;;  %1137 = vst.msk [vmem:[#allocation4 + $0x50] sm:$0xff] %vm531_vm3, %v542_v28  ;;  %1141 = vst.msk [vmem:[#allocation4 + $0x70] sm:$0xff] %vm531_vm3, %v546_v29  ;;  %v543_v36 = vadd.f32 %v1238_v16, %v525_v30 }
 0x1e5   : > { %535 = vst.msk [vmem:[#allocation3 + $0x18] sm:$0xff] %vm531_vm3, %v525_v30  ;;  %539 = vst.msk [vmem:[#allocation3 + $0x38] sm:$0xff] %vm531_vm3, %v529_v31  ;;  %v547_v37 = vadd.f32 %v1242_v17, %v529_v31 }
 0x1e6   : > { %1135 = vst.msk [vmem:[#allocation4 + $0x40] sm:$0xff] %vm531_vm3, %v540_v32  ;;  %1139 = vst.msk [vmem:[#allocation4 + $0x60] sm:$0xff] %vm531_vm3, %v544_v33  ;;  %v541_v38 = vadd.f32 %v523_v34, %v469_v22  ;;  %v545_v39 = vadd.f32 %v527_v35, %v485_v23 }
 0x1e7   : > { %533 = vst.msk [vmem:[#allocation3 + $0x8] sm:$0xff] %vm531_vm3, %v523_v34  ;;  %537 = vst.msk [vmem:[#allocation3 + $0x28] sm:$0xff] %vm531_vm3, %v527_v35 }
 0x1e8   : > { %1138 = vst.msk [vmem:[#allocation4 + $0x58] sm:$0xff] %vm531_vm3, %v543_v36  ;;  %1142 = vst.msk [vmem:[#allocation4 + $0x78] sm:$0xff] %vm531_vm3, %v547_v37 }
 0x1e9   : > { %1136 = vst.msk [vmem:[#allocation4 + $0x48] sm:$0xff] %vm531_vm3, %v541_v38  ;;  %1140 = vst.msk [vmem:[#allocation4 + $0x68] sm:$0xff] %vm531_vm3, %v545_v39 }
 0x1ea PF: > { %p1143_p6 = scmp.le.s32.totalorder %s1387_s21, 0 }
 0x1eb   : > { %p562_p7 = scmp.lt.s32.totalorder (!%p1143_p6), %s1387_s21, 0  ;;  %s563_s19 = ssub.s32 (!%p1143_p6), 0, %s1387_s21 }
 0x1ec   : > { %561 = sbr.rel (%p1143_p6) target bundleno = 984 (0x3d8), region = 56  ;;  %s1144_s20 = smin.u32 (!%p1143_p6), %s1387_s21, %s563_s19 }
 0x1ed   : > { %s565_s25 = sand.u32 (!%p1143_p6), 1, %s1144_s20  }
 0x1ee   : > { %s566_s26 = ssub.s32 (!%p1143_p6), 0, %s565_s25 }
 0x1f3   : > { %s1732_s26 = smov (!%p562_p7, %s566_s26), %s565_s25 }
 0x1f4   : > { %p1146_p8 = scmp.lt.s32.totalorder %s1732_s26, 0  ;;  %s572_s27 = sadd.s32 2, %s1732_s26 }
 0x1f6   : > { %s1734_s27 = smov (!%p1146_p8, %s572_s27), %s1732_s26 }
 0x1f7   : > { %p1147_p9 = scmp.ne.s32.totalorder %s1734_s27, 1 }
 0x1f8   : > { %v579_v48 = vld [vmem:[#allocation4 + $0x40] sm:$0xff] (!%p1147_p9)  ;;  %v580_v49 = vld [vmem:[#allocation4 + $0x48] sm:$0xff] (!%p1147_p9)  ;;  %v581_v50 = vld [vmem:[#allocation4 + $0x50] sm:$0xff] (!%p1147_p9)  ;;  %v1148_v51 = vcombine.low (!%p1147_p9), %v1497_v40, %v1502_v41  ;;  %vm620_vm4 = vcmask (!%p1147_p9), 523264   ;;  %v1150_v52 = vcombine.low (!%p1147_p9), %v1517_v44, %v1522_v45  ;;  %v1149_v62 = vcombine.low (!%p1147_p9), %v1507_v42, %v1512_v43 }
 0x1f9   : > { %577 = sbr.rel (%p1147_p9) target bundleno = 741 (0x2e5), region = 60  ;;  %v587_v53 = vpack.c.bf16 (!%p1147_p9), %v580_v49, %v579_v48  ;;  %v582_v54 = vld [vmem:[#allocation4 + $0x58] sm:$0xff] (!%p1147_p9)  ;;  %v583_v56 = vld [vmem:[#allocation4 + $0x60] sm:$0xff] (!%p1147_p9)  ;;  %v584_v57 = vld [vmem:[#allocation4 + $0x68] sm:$0xff] (!%p1147_p9)  ;;  %v1151_v63 = vcombine.low (!%p1147_p9), %v1527_v46, %v1532_v47  ;;  %vm699_vm5 = vcmask (!%p1147_p9), 261120  }
 0x1fa   : > { %v588_v55 = vpack.c.bf16 (!%p1147_p9), %v582_v54, %v581_v50  ;;  %1251 = vmatprep.mubr.msk.bf16.mxu0 (!%p1147_p9), %vm620_vm4, %v1148_v51  ;;  %1255 = vmatprep.mubr.msk.bf16.mxu1 (!%p1147_p9), %vm620_vm4, %v1150_v52  ;;  %v589_v58 = vpack.c.bf16 (!%p1147_p9), %v584_v57, %v583_v56  ;;  %v585_v59 = vld [vmem:[#allocation4 + $0x70] sm:$0xff] (!%p1147_p9)  ;;  %v586_v60 = vld [vmem:[#allocation4 + $0x78] sm:$0xff] (!%p1147_p9)  ;;  %v592_v2 = vld [vmem:[#allocation3] sm:$0xff] (!%p1147_p9) }
 0x1fb   : > { %1243 = vmatprep.subr.bf16.mxu0 (!%p1147_p9), %v587_v53  ;;  %1297 = vmatprep.subr.bf16.mxu1 (!%p1147_p9), %v587_v53  ;;  %v590_v61 = vpack.c.bf16 (!%p1147_p9), %v586_v60, %v585_v59  ;;  %v594_v0 = vld [vmem:[#allocation3 + $0x10] sm:$0xff] (!%p1147_p9)  ;;  %v596_v3 = vld [vmem:[#allocation3 + $0x20] sm:$0xff] (!%p1147_p9)  ;;  %v595_v6 = vld [vmem:[#allocation3 + $0x18] sm:$0xff] (!%p1147_p9) }
 0x1fc   : > { %1244 = vmatpush3.bf16.msra.mxu0 (!%p1147_p9), %v587_v53  ;;  %1301 = vmatpush3.bf16.msra.mxu1 (!%p1147_p9), %v587_v53  ;;  %v598_v1 = vld [vmem:[#allocation3 + $0x30] sm:$0xff] (!%p1147_p9)  ;;  %v599_v7 = vld [vmem:[#allocation3 + $0x38] sm:$0xff] (!%p1147_p9)  ;;  %v593_v12 = vld [vmem:[#allocation3 + $0x8] sm:$0xff] (!%p1147_p9) }
 0x1fd   : > { %1245 = vmatprep.subr.bf16.mxu0 (!%p1147_p9), %v588_v55  ;;  %1298 = vmatprep.subr.bf16.mxu1 (!%p1147_p9), %v588_v55  ;;  %v597_v13 = vld [vmem:[#allocation3 + $0x28] sm:$0xff] (!%p1147_p9) }
 0x200   : > { %1246 = vmatpush3.bf16.msra.mxu0 %v588_v55  ;;  %1302 = vmatpush3.bf16.msra.mxu1 %v588_v55 }
 0x201   : > { %1247 = vmatprep.subr.bf16.mxu0 %v589_v58  ;;  %1299 = vmatprep.subr.bf16.mxu1 %v589_v58 }
 0x204   : > { %1248 = vmatpush3.bf16.msra.mxu0 %v589_v58  ;;  %1303 = vmatpush3.bf16.msra.mxu1 %v589_v58 }
 0x205   : > { %1249 = vmatprep.subr.bf16.mxu0 %v590_v61  ;;  %1300 = vmatprep.subr.bf16.mxu1 %v590_v61 }
 0x208   : > { %1250 = vmatpush3.bf16.msra.mxu0 %v590_v61  ;;  %1304 = vmatpush3.bf16.msra.mxu1 %v590_v61 }
 0x20b   : > { %1252 = vmatmul.mubr.msk.bf16.vlgmr.msra.gmra.mrb[0].mxu0 %vm620_vm4, %v1149_v62  ;;  %1256 = vmatmul.mubr.msk.bf16.vlgmr.msra.gmra.mrb[0].mxu1 %vm620_vm4, %v1151_v63 }
 0x2de   : > { %v1253_v4 = vpop.f32.mrb[0].mxu0  ;;  %v1257_v5 = vpop.f32.mrb[0].mxu1 }
 0x2df   : > { %v676_v8 = vadd.f32 %v1253_v4, %v594_v0  ;;  %v692_v9 = vadd.f32 %v1257_v5, %v598_v1  ;;  %v667_v10 = vpop.f32.mrb[1].mxu0  ;;  %v683_v11 = vpop.f32.mrb[1].mxu1 }
 0x2e0   : > { %v668_v14 = vadd.f32 %v667_v10, %v592_v2  ;;  %v684_v15 = vadd.f32 %v683_v11, %v596_v3  ;;  %v1254_v16 = vpop.f32.mrb[2].mxu0  ;;  %v1258_v17 = vpop.f32.mrb[2].mxu1 }
 0x2e1   : > { %702 = vst.msk [vmem:[#allocation4 + $0x10] sm:$0xff] %vm699_vm5, %v676_v8  ;;  %706 = vst.msk [vmem:[#allocation4 + $0x30] sm:$0xff] %vm699_vm5, %v692_v9  ;;  %v679_v18 = vadd.f32 %v1254_v16, %v595_v6  ;;  %v695_v19 = vadd.f32 %v1258_v17, %v599_v7  ;;  %v670_v20 = vpop.f32.mrb[3].mxu0  ;;  %v686_v21 = vpop.f32.mrb[3].mxu1 }
 0x2e2   : > { %700 = vst.msk [vmem:[#allocation4] sm:$0xff] %vm699_vm5, %v668_v14  ;;  %704 = vst.msk [vmem:[#allocation4 + $0x20] sm:$0xff] %vm699_vm5, %v684_v15  ;;  %v671_v22 = vadd.f32 %v670_v20, %v593_v12  ;;  %v687_v23 = vadd.f32 %v686_v21, %v597_v13 }
 0x2e3   : > { %703 = vst.msk [vmem:[#allocation4 + $0x18] sm:$0xff] %vm699_vm5, %v679_v18  ;;  %707 = vst.msk [vmem:[#allocation4 + $0x38] sm:$0xff] %vm699_vm5, %v695_v19 }
 0x2e4   : > { %701 = vst.msk [vmem:[#allocation4 + $0x8] sm:$0xff] %vm699_vm5, %v671_v22  ;;  %705 = vst.msk [vmem:[#allocation4 + $0x28] sm:$0xff] %vm699_vm5, %v687_v23 }
 0x2e5 PF: > { %p1156_p10 = scmp.ne.s32.totalorder %s1734_s27, 0 }
 0x2e6   : > { %v1157_v27 = vcombine.low (!%p1156_p10), %v1497_v40, %v1502_v41  ;;  %vm753_vm6 = vcmask (!%p1156_p10), 523264   ;;  %v1159_v28 = vcombine.low (!%p1156_p10), %v1517_v44, %v1522_v45  ;;  %v1158_v45 = vcombine.low (!%p1156_p10), %v1507_v42, %v1512_v43  ;;  %v727_v36 = vld [vmem:[#allocation3 + $0x10] sm:$0xff] (!%p1156_p10)  ;;  %v725_v38 = vld [vmem:[#allocation3] sm:$0xff] (!%p1156_p10)  ;;  %v728_v50 = vld [vmem:[#allocation3 + $0x18] sm:$0xff] (!%p1156_p10) }
 0x2e7   : > { %711 = sbr.rel (%p1156_p10) target bundleno = 984 (0x3d8), region = 64  ;;  %v1160_v35 = vcombine.low (!%p1156_p10), %v1527_v46, %v1532_v47  ;;  %v731_v37 = vld [vmem:[#allocation3 + $0x30] sm:$0xff] (!%p1156_p10)  ;;  %v729_v39 = vld [vmem:[#allocation3 + $0x20] sm:$0xff] (!%p1156_p10)  ;;  %vm833_vm7 = vcmask (!%p1156_p10), 261120   ;;  %v732_v51 = vld [vmem:[#allocation3 + $0x38] sm:$0xff] (!%p1156_p10) }
 0x2e8   : > { %v714_v26 = vld [vmem:[#allocation4 + $0x10] sm:$0xff] (!%p1156_p10)  ;;  %1267 = vmatprep.mubr.msk.bf16.mxu0 (!%p1156_p10), %vm753_vm6, %v1157_v27  ;;  %1271 = vmatprep.mubr.msk.bf16.mxu1 (!%p1156_p10), %vm753_vm6, %v1159_v28  ;;  %v726_v46 = vld [vmem:[#allocation3 + $0x8] sm:$0xff] (!%p1156_p10) }
 0x2e9   : > { %v712_v24 = vld [vmem:[#allocation4] sm:$0xff] (!%p1156_p10)  ;;  %v718_v41 = vld [vmem:[#allocation4 + $0x30] sm:$0xff] (!%p1156_p10)  ;;  %v730_v47 = vld [vmem:[#allocation3 + $0x28] sm:$0xff] (!%p1156_p10) }
 0x2ea   : > { %v715_v30 = vld [vmem:[#allocation4 + $0x18] sm:$0xff] (!%p1156_p10)  ;;  %v716_v32 = vld [vmem:[#allocation4 + $0x20] sm:$0xff] (!%p1156_p10) }
 0x2eb   : > { %v713_v25 = vld [vmem:[#allocation4 + $0x8] sm:$0xff] (!%p1156_p10)  ;;  %v721_v31 = vpack.c.bf16 (!%p1156_p10), %v715_v30, %v714_v26  ;;  %v719_v34 = vld [vmem:[#allocation4 + $0x38] sm:$0xff] (!%p1156_p10) }
 0x2ec   : > { %v720_v29 = vpack.c.bf16 (!%p1156_p10), %v713_v25, %v712_v24  ;;  %v717_v33 = vld [vmem:[#allocation4 + $0x28] sm:$0xff] (!%p1156_p10)  ;;  %v723_v44 = vpack.c.bf16 (!%p1156_p10), %v719_v34, %v718_v41 }
 0x2ed   : > { %v722_v40 = vpack.c.bf16 (!%p1156_p10), %v717_v33, %v716_v32 }
 0x2ee   : > { %1259 = vmatprep.subr.bf16.mxu0 %v720_v29  ;;  %1305 = vmatprep.subr.bf16.mxu1 %v720_v29 }
 0x2ef   : > { %1260 = vmatpush3.bf16.msra.mxu0 %v720_v29  ;;  %1309 = vmatpush3.bf16.msra.mxu1 %v720_v29 }
 0x2f0   : > { %1261 = vmatprep.subr.bf16.mxu0 %v721_v31  ;;  %1306 = vmatprep.subr.bf16.mxu1 %v721_v31 }
 0x2f3   : > { %1262 = vmatpush3.bf16.msra.mxu0 %v721_v31  ;;  %1310 = vmatpush3.bf16.msra.mxu1 %v721_v31 }
 0x2f4   : > { %1263 = vmatprep.subr.bf16.mxu0 %v722_v40  ;;  %1307 = vmatprep.subr.bf16.mxu1 %v722_v40 }
 0x2f7   : > { %1264 = vmatpush3.bf16.msra.mxu0 %v722_v40  ;;  %1311 = vmatpush3.bf16.msra.mxu1 %v722_v40 }
 0x2f8   : > { %1265 = vmatprep.subr.bf16.mxu0 %v723_v44  ;;  %1308 = vmatprep.subr.bf16.mxu1 %v723_v44 }
 0x2fb   : > { %1266 = vmatpush3.bf16.msra.mxu0 %v723_v44  ;;  %1312 = vmatpush3.bf16.msra.mxu1 %v723_v44 }
 0x2fe   : > { %1268 = vmatmul.mubr.msk.bf16.vlgmr.msra.gmra.mrb[0].mxu0 %vm753_vm6, %v1158_v45  ;;  %1272 = vmatmul.mubr.msk.bf16.vlgmr.msra.gmra.mrb[0].mxu1 %vm753_vm6, %v1160_v35 }
 0x3d1   : > { %v1269_v48 = vpop.f32.mrb[0].mxu0  ;;  %v1273_v49 = vpop.f32.mrb[0].mxu1 }
 0x3d2   : > { %v809_v52 = vadd.f32 %v1269_v48, %v727_v36  ;;  %v825_v42 = vadd.f32 %v1273_v49, %v731_v37  ;;  %v800_v43 = vpop.f32.mrb[1].mxu0  ;;  %v816_v53 = vpop.f32.mrb[1].mxu1 }
 0x3d3   : > { %v801_v54 = vadd.f32 %v800_v43, %v725_v38  ;;  %v817_v55 = vadd.f32 %v816_v53, %v729_v39  ;;  %v1270_v56 = vpop.f32.mrb[2].mxu0  ;;  %v1274_v57 = vpop.f32.mrb[2].mxu1 }
 0x3d4   : > { %1167 = vst.msk [vmem:[#allocation4 + $0x50] sm:$0xff] %vm833_vm7, %v809_v52  ;;  %1171 = vst.msk [vmem:[#allocation4 + $0x70] sm:$0xff] %vm833_vm7, %v825_v42  ;;  %v812_v58 = vadd.f32 %v1270_v56, %v728_v50  ;;  %v828_v59 = vadd.f32 %v1274_v57, %v732_v51  ;;  %v803_v60 = vpop.f32.mrb[3].mxu0  ;;  %v819_v61 = vpop.f32.mrb[3].mxu1 }
 0x3d5   : > { %1165 = vst.msk [vmem:[#allocation4 + $0x40] sm:$0xff] %vm833_vm7, %v801_v54  ;;  %1169 = vst.msk [vmem:[#allocation4 + $0x60] sm:$0xff] %vm833_vm7, %v817_v55  ;;  %v804_v62 = vadd.f32 %v803_v60, %v726_v46  ;;  %v820_v63 = vadd.f32 %v819_v61, %v730_v47 }
 0x3d6   : > { %1168 = vst.msk [vmem:[#allocation4 + $0x58] sm:$0xff] %vm833_vm7, %v812_v58  ;;  %1172 = vst.msk [vmem:[#allocation4 + $0x78] sm:$0xff] %vm833_vm7, %v828_v59 }
 0x3d7   : > { %1166 = vst.msk [vmem:[#allocation4 + $0x48] sm:$0xff] %vm833_vm7, %v804_v62  ;;  %1170 = vst.msk [vmem:[#allocation4 + $0x68] sm:$0xff] %vm833_vm7, %v820_v63 }
 0x3d8 PF: > { %p1173_p11 = scmp.ne.s32.totalorder %s1387_s21, 9 }
 0x3d9   : > { %v859_v0 = vld [vmem:[%s1724_s4] sm:$0xff] (!%p1173_p11)  ;;  %v860_v1 = vld [vmem:[%s1724_s4 + $0x8] sm:$0xff] (!%p1173_p11)  ;;  %v861_v2 = vld [vmem:[%s1724_s4 + $0x10] sm:$0xff] (!%p1173_p11)  ;;  %vm872_vm8 = vcmask (!%p1173_p11), 261120   ;;  %vm950_vm9 = vcmask (!%p1173_p11), 64512  }
 0x3da   : > { %845 = sbr.rel (%p1173_p11) target bundleno = 1544 (0x608), region = 68  ;;  %v863_v3 = vpack.c.bf16 (!%p1173_p11), %v860_v1, %v859_v0  ;;  %v862_v4 = vld [vmem:[%s1724_s4 + $0x18] sm:$0xff] (!%p1173_p11)  ;;  %v847_v5 = vld [vmem:[#allocation4] sm:$0xff] (!%p1173_p11)  ;;  %v848_v6 = vld [vmem:[#allocation4 + $0x8] sm:$0xff] (!%p1173_p11) }
 0x3db   : > { %v864_v7 = vpack.c.bf16 (!%p1173_p11), %v862_v4, %v861_v2  ;;  %v855_v8 = vpack.c.bf16 (!%p1173_p11), %v848_v6, %v847_v5  ;;  %v851_v9 = vld [vmem:[#allocation4 + $0x20] sm:$0xff] (!%p1173_p11)  ;;  %v849_v10 = vld [vmem:[#allocation4 + $0x10] sm:$0xff] (!%p1173_p11)  ;;  %v852_v11 = vld [vmem:[#allocation4 + $0x28] sm:$0xff] (!%p1173_p11) }
 0x3dc   : > { %1275 = vmatprep.subr.bf16.mxu0 (!%p1173_p11), %v863_v3  ;;  %1313 = vmatprep.subr.bf16.mxu1 (!%p1173_p11), %v863_v3  ;;  %v850_v12 = vld [vmem:[#allocation4 + $0x18] sm:$0xff] (!%p1173_p11)  ;;  %v857_v13 = vpack.c.bf16 (!%p1173_p11), %v852_v11, %v851_v9  ;;  %v853_v14 = vld [vmem:[#allocation4 + $0x30] sm:$0xff] (!%p1173_p11)  ;;  %v1174_v18 = vld [vmem:[%s1725_s5] ss:$0 sm:$0xff] (!%p1173_p11) }
 0x3dd   : > { %1276 = vmatpush3.bf16.msra.mxu0 (!%p1173_p11), %v863_v3  ;;  %1315 = vmatpush3.bf16.msra.mxu1 (!%p1173_p11), %v863_v3  ;;  %v854_v15 = vld [vmem:[#allocation4 + $0x38] sm:$0xff] (!%p1173_p11)  ;;  %v856_v16 = vpack.c.bf16 (!%p1173_p11), %v850_v12, %v849_v10 }
 0x3de   : > { %1277 = vmatprep.subr.bf16.mxu0 (!%p1173_p11), %v864_v7  ;;  %1314 = vmatprep.subr.bf16.mxu1 (!%p1173_p11), %v864_v7  ;;  %v858_v17 = vpack.c.bf16 (!%p1173_p11), %v854_v15, %v853_v14 }
 0x3df   : > { %1279 = vmatprep.mubr.msk.bf16.mxu0 (!%p1173_p11), %vm872_vm8, %v855_v8  ;;  %1283 = vmatprep.mubr.msk.bf16.mxu1 (!%p1173_p11), %vm872_vm8, %v857_v13 }
 0x3e1   : > { %1278 = vmatpush3.bf16.msra.mxu0 %v864_v7  ;;  %1316 = vmatpush3.bf16.msra.mxu1 %v864_v7 }
 0x3e4   : > { %1280 = vmatmul.mubr.msk.bf16.vlgmr.msra.gmra.mrb[0].mxu0 %vm872_vm8, %v856_v16  ;;  %1284 = vmatmul.mubr.msk.bf16.vlgmr.msra.gmra.mrb[0].mxu1 %vm872_vm8, %v858_v17 }
 0x4b7   : > { %v1281_v19 = vpop.f32.mrb[0].mxu0  ;;  %v1285_v20 = vpop.f32.mrb[0].mxu1 }
 0x4b8   : > { %v928_v21 = vadd.f32 %v1281_v19, %v1174_v18  ;;  %v919_v22 = vpop.f32.mrb[1].mxu0  ;;  %v935_v23 = vpop.f32.mrb[1].mxu1  ;;  %v944_v35 = vadd.f32 %v1285_v20, %v1174_v18 }
 0x4b9   : > { %v920_v24 = vadd.f32 %v1174_v18, %v919_v22  ;;  %v1282_v25 = vpop.f32.mrb[2].mxu0  ;;  %v936_v26 = vadd.f32 %v1174_v18, %v935_v23  ;;  %v1286_v27 = vpop.f32.mrb[2].mxu1 }
 0x4ba   : > { %v931_v28 = vadd.f32 %v1282_v25, %v1174_v18  ;;  %v922_v29 = vpop.f32.mrb[3].mxu0  ;;  %v938_v30 = vpop.f32.mrb[3].mxu1  ;;  %v957_v31 = vsel %vm950_vm9, %v928_v21, -inf  ;;  %v947_v44 = vadd.f32 %v1286_v27, %v1174_v18  ;;  %v969_v38 = vsel %vm950_vm9, %v944_v35, -inf }
 0x4bb   : > { %958 = vmax.xlane.f32.xlu1 %v957_v31  ;;  %v951_v32 = vsel %vm950_vm9, %v920_v24, -inf  ;;  %v963_v33 = vsel %vm950_vm9, %v936_v26, -inf  ;;  %v939_v40 = vadd.f32 %v1174_v18, %v938_v30  ;;  %v923_v34 = vadd.f32 %v1174_v18, %v922_v29 }
 0x4bc   : > { %952 = vmax.xlane.f32.xlu0 %v951_v32  ;;  %v960_v41 = vsel %vm950_vm9, %v931_v28, -inf  ;;  %v972_v37 = vsel %vm950_vm9, %v947_v44, -inf }
 0x4bd   : > { %v966_v45 = vsel %vm950_vm9, %v939_v40, -inf  ;;  %v954_v36 = vsel %vm950_vm9, %v923_v34, -inf }
 0x4bf   : > { %961 = vmax.xlane.f32.xlu1 %v960_v41 }
 0x4c0   : > { %964 = vmax.xlane.f32.xlu0 %v963_v33 }
 0x4c3   : > { %967 = vmax.xlane.f32.xlu1 %v966_v45 }
 0x4c4   : > { %955 = vmax.xlane.f32.xlu0 %v954_v36 }
 0x4c7   : > { %973 = vmax.xlane.f32.xlu1 %v972_v37 }
 0x4c8   : > { %970 = vmax.xlane.f32.xlu0 %v969_v38 }
 0x548   : > { %v959_v39 = vpop.xlane.xlu1 %958 }
 0x549   : > { %v1639_v48 = vsub.f32 %v928_v21, %v959_v39  ;;  %v953_v49 = vpop.xlane.xlu0 %952 }
 0x54a   : > { %v1641_v50 = vsub.f32 %v920_v24, %v953_v49 }
 0x54b   : > { %v987_v51 = vmul.f32 1.442695, %v1639_v48 }
 0x54c   : > { %v983_v52 = vmul.f32 1.442695, %v1641_v50  ;;  %v962_v42 = vpop.xlane.xlu1 %961 }
 0x54d   : > { %1341 = vpow2.f32 %v987_v51  ;;  %v1645_v43 = vsub.f32 %v931_v28, %v962_v42  ;;  %v965_v53 = vpop.xlane.xlu0 %964 }
 0x54e   : > { %v1647_v46 = vsub.f32 %v936_v26, %v965_v53  ;;  %1343 = vpow2.f32 %v983_v52 }
 0x54f   : > { %v989_v47 = vmul.f32 1.442695, %v1645_v43 }
 0x550   : > { %v991_v54 = vmul.f32 1.442695, %v1647_v46  ;;  %v968_v55 = vpop.xlane.xlu1 %967 }
 0x551   : > { %1345 = vpow2.f32 %v989_v47  ;;  %v1651_v56 = vsub.f32 %v939_v40, %v968_v55  ;;  %v956_v57 = vpop.xlane.xlu0 %955 }
 0x552   : > { %v1653_v58 = vsub.f32 %v923_v34, %v956_v57  ;;  %1347 = vpow2.f32 %v991_v54 }
 0x553   : > { %v993_v59 = vmul.f32 1.442695, %v1651_v56 }
 0x554   : > { %v985_v60 = vmul.f32 1.442695, %v1653_v58  ;;  %v974_v61 = vpop.xlane.xlu1 %973 }
 0x555   : > { %v1657_v62 = vsub.f32 %v947_v44, %v974_v61  ;;  %v971_v63 = vpop.xlane.xlu0 %970 }
 0x556   : > { %1349 = vpow2.f32 %v985_v60  ;;  %v1659_v0 = vsub.f32 %v944_v35, %v971_v63 }
 0x557   : > { %v1342_v1 = vpop.eup %1341  ;;  %1351 = vpow2.f32 %v993_v59  ;;  %v997_v2 = vmul.f32 1.442695, %v1657_v62 }
 0x558   : > { %v995_v3 = vmul.f32 1.442695, %v1659_v0  ;;  %v1005_v4 = vsel %vm950_vm9, %v1342_v1, 0.0  ;;  %v1344_v5 = vpop.eup %1343 }
 0x559   : > { %1006 = vadd.xlane.f32.xlu0 %v1005_v4  ;;  %v999_v8 = vsel %vm950_vm9, %v1344_v5, 0.0 }
 0x55a   : > { %1353 = vpow2.f32 %v995_v3 }
 0x55b   : > { %v1346_v6 = vpop.eup %1345  ;;  %1355 = vpow2.f32 %v997_v2 }
 0x55c   : > { %v1008_v7 = vsel %vm950_vm9, %v1346_v6, 0.0  ;;  %v1348_v9 = vpop.eup %1347 }
 0x55d   : > { %1009 = vadd.xlane.f32.xlu1 %v1008_v7  ;;  %1000 = vadd.xlane.f32.xlu0 %v999_v8  ;;  %v1011_v11 = vsel %vm950_vm9, %v1348_v9, 0.0 }
 0x560   : > { %v1350_v10 = vpop.eup %1349 }
 0x561   : > { %1012 = vadd.xlane.f32.xlu0 %v1011_v11  ;;  %v1002_v12 = vsel %vm950_vm9, %v1350_v10, 0.0  ;;  %v1352_v13 = vpop.eup %1351 }
 0x562   : > { %1003 = vadd.xlane.f32.xlu1 %v1002_v12  ;;  %v1014_v15 = vsel %vm950_vm9, %v1352_v13, 0.0 }
 0x564   : > { %v1354_v14 = vpop.eup %1353 }
 0x565   : > { %v1017_v16 = vsel %vm950_vm9, %v1354_v14, 0.0  ;;  %v1356_v17 = vpop.eup %1355 }
 0x566   : > { %1015 = vadd.xlane.f32.xlu1 %v1014_v15  ;;  %1018 = vadd.xlane.f32.xlu0 %v1017_v16  ;;  %v1020_v18 = vsel %vm950_vm9, %v1356_v17, 0.0 }
 0x56a   : > { %1021 = vadd.xlane.f32.xlu1 %v1020_v18 }
 0x5e6   : > { %v1007_v19 = vpop.xlane.xlu0 %1006 }
 0x5e7   : > { %1357 = vlog2.f32 %v1007_v19 }
 0x5ea   : > { %v1010_v20 = vpop.xlane.xlu1 %1009  ;;  %v1001_v21 = vpop.xlane.xlu0 %1000 }
 0x5eb   : > { %1359 = vlog2.f32 %v1010_v20 }
 0x5ec   : > { %1361 = vlog2.f32 %v1001_v21 }
 0x5ee   : > { %v1013_v22 = vpop.xlane.xlu0 %1012 }
 0x5ef   : > { %1363 = vlog2.f32 %v1013_v22  ;;  %v1004_v23 = vpop.xlane.xlu1 %1003 }
 0x5f0   : > { %1365 = vlog2.f32 %v1004_v23 }
 0x5f1   : > { %v1358_v24 = vpop.eup %1357 }
 0x5f2   : > { %v1028_v25 = vmul.f32 0.6931472, %v1358_v24 }
 0x5f3   : > { %v1016_v26 = vpop.xlane.xlu1 %1015  ;;  %v1019_v27 = vpop.xlane.xlu0 %1018 }
 0x5f4   : > { %v1041_v28 = vsub.f32 %v1639_v48, %v1028_v25  ;;  %1367 = vlog2.f32 %v1016_v26 }
 0x5f5   : > { %v1360_v29 = vpop.eup %1359  ;;  %1369 = vlog2.f32 %v1019_v27 }
 0x5f6   : > { %v1362_v30 = vpop.eup %1361  ;;  %1050 = vst.msk [vmem:[%s1726_s6 + $0x10] sm:$0xff] %vm950_vm9, %v1041_v28  ;;  %v1030_v31 = vmul.f32 0.6931472, %v1360_v29 }
 0x5f7   : > { %v1024_v32 = vmul.f32 0.6931472, %v1362_v30  ;;  %v1022_v33 = vpop.xlane.xlu1 %1021 }
 0x5f8   : > { %v1042_v40 = vsub.f32 %v1645_v43, %v1030_v31  ;;  %1371 = vlog2.f32 %v1022_v33 }
 0x5f9   : > { %v1364_v41 = vpop.eup %1363  ;;  %v1039_v34 = vsub.f32 %v1641_v50, %v1024_v32 }
 0x5fa   : > { %v1366_v44 = vpop.eup %1365  ;;  %1051 = vst.msk [vmem:[%s1726_s6 + $0x18] sm:$0xff] %vm950_vm9, %v1042_v40  ;;  %v1032_v45 = vmul.f32 0.6931472, %v1364_v41 }
 0x5fb   : > { %1048 = vst.msk [vmem:[%s1726_s6] sm:$0xff] %vm950_vm9, %v1039_v34  ;;  %v1026_v35 = vmul.f32 0.6931472, %v1366_v44 }
 0x5fc   : > { %v1043_v36 = vsub.f32 %v1647_v46, %v1032_v45 }
 0x5fd   : > { %v1040_v37 = vsub.f32 %v1653_v58, %v1026_v35 }
 0x5fe   : > { %v1368_v38 = vpop.eup %1367  ;;  %1052 = vst.msk [vmem:[%s1726_s6 + $0x20] sm:$0xff] %vm950_vm9, %v1043_v36 }
 0x5ff   : > { %v1370_v39 = vpop.eup %1369  ;;  %1049 = vst.msk [vmem:[%s1726_s6 + $0x8] sm:$0xff] %vm950_vm9, %v1040_v37  ;;  %v1034_v48 = vmul.f32 0.6931472, %v1368_v38 }
 0x600   : > { %v1036_v49 = vmul.f32 0.6931472, %v1370_v39 }
 0x601   : > { %v1044_v50 = vsub.f32 %v1651_v56, %v1034_v48 }
 0x602   : > { %v1372_v51 = vpop.eup %1371  ;;  %v1045_v52 = vsub.f32 %v1659_v0, %v1036_v49 }
 0x603   : > { %1053 = vst.msk [vmem:[%s1726_s6 + $0x28] sm:$0xff] %vm950_vm9, %v1044_v50  ;;  %v1038_v42 = vmul.f32 0.6931472, %v1372_v51 }
 0x604   : > { %1054 = vst.msk [vmem:[%s1726_s6 + $0x30] sm:$0xff] %vm950_vm9, %v1045_v52 }
 0x605   : > { %v1046_v43 = vsub.f32 %v1657_v62, %v1038_v42 }
 0x607   : > { %1055 = vst.msk [vmem:[%s1726_s6 + $0x38] sm:$0xff] %vm950_vm9, %v1046_v43 }
 0x608 PF: > { %s16_s23 = sadd.s32 1, %s1395_s23   ;;  %s1727_s21 = smov %s1391_s22 }
 0x609   : > { %p13_p12 = scmp.ge.s32.totalorder %s16_s23, 12   ;;  %s1728_s22 = smov %s1730_s24 }
 0x60b   :  { %15 = sbr.rel (!%p13_p12) target bundleno = 2 (0x2), region = 104 }

</bundles_post_ra>
